<compile_context>
chip_gen: v5e
topology: v5e:2x2
jax: 0.10.0
libtpu: 0.0.40
codegen_flags: <defaults>
</compile_context>

<pallas_src>
import math

import jax
import jax.numpy as jnp
from jax.experimental import pallas as pl
from jax.experimental.pallas import tpu as pltpu


def _default_compute_dtype():
    """bf16 MXU operands on v6e/v7x (full-rate MXU, half the x_t bytes); f32 elsewhere."""
    try:
        kind = jax.devices()[0].device_kind.lower()
    except Exception:
        return jnp.float32
    if ("v6" in kind) or ("v7" in kind):
        return jnp.bfloat16
    return jnp.float32


def _gcn_kernel(x_ref, wseq_t_ref, w_fused_ref, bias_ref, o_ref):
    # x_ref:      (bb, S, C_in*N)      compute dtype    x_t rows for this batch block
    # wseq_t_ref: (S, S)               compute dtype    weight_seq.T (resident)
    # w_fused_ref:(C_in*N, C_out*N)    compute dtype    kron(weight_c, att.T) (resident)
    # bias_ref:   (S, 1)               float32
    # o_ref:      (bb, S, C_out*N)     output dtype
    bb = x_ref.shape[0]
    wseq_t = wseq_t_ref[...]
    w_fused = w_fused_ref[...]
    bias = bias_ref[...]
    # Static per-sample loop: the seq mix cannot mix samples, and bb is kept small
    # by construction.  Both dots accumulate in f32 on the MXU; bias add stays f32.
    for b in range(bb):
        z = jnp.dot(wseq_t, x_ref[b], preferred_element_type=jnp.float32)      # (S, C_in*N)
        out = jnp.dot(z.astype(w_fused.dtype), w_fused,
                      preferred_element_type=jnp.float32)                       # (S, C_out*N)
        o_ref[b] = (out + bias).astype(o_ref.dtype)


def graph_convolution(x, att, weight_c, weight_seq, bias=None, *,
                      compute_dtype=None, batch_block=None):
    """Pallas GraphConvolution forward.

    x: (B, C_in, N, S); att: (N, N); weight_c: (C_in, C_out); weight_seq: (S, S);
    bias: (S,) or None.  Returns (B, C_out, N, S), matching the PyTorch module.
    """
    B, C_in, N, S = x.shape
    C_out = weight_c.shape[1]
    K_in, K_out = C_in * N, C_out * N
    out_dtype = x.dtype

    if compute_dtype is None:
        compute_dtype = _default_compute_dtype()
    itemsize = jnp.dtype(compute_dtype).itemsize

    # ---- batch-block selection -------------------------------------------------
    # Keep >= 2 parallel grid steps (v7x has 2 TensorCores) and cap the per-step
    # activation block around ~0.5 MiB so pipeline overhead is amortized without
    # blowing VMEM (v7x: 64 MiB physical / 32 MiB scoped default).
    if batch_block is None:
        per_sample_bytes = S * K_in * itemsize
        cap = max(1, min(B // 2 if B > 1 else 1, (512 * 1024) // max(per_sample_bytes, 1)))
        bb = max(d for d in range(1, cap + 1) if B % d == 0)
    else:
        bb = batch_block
        assert B % bb == 0, "batch_block must divide B"
    num_blocks = B // bb

    if bias is None:
        bias = jnp.zeros((S,), jnp.float32)

    # ---- wrapper-side layout plumbing + parameter fusion (tiny XLA ops) --------
    # x_t[b, s', c*N + n'] = x[b, c, n', s']   (transpose fuses with the convert)
    x_t = jnp.transpose(x, (0, 3, 1, 2)).reshape(B, S, K_in).astype(compute_dtype)
    # Resident seq mixer: one (S, S) operand — no block-diagonal kron.
    wseq_t = weight_seq.T.astype(compute_dtype)
    # Fused node/channel weight: W[c*N+n', o*N+n] = weight_c[c,o] * att[n,n'].
    w_fused = jnp.kron(weight_c.astype(jnp.float32),
                       att.T.astype(jnp.float32)).astype(compute_dtype)
    bias_col = bias.astype(jnp.float32).reshape(S, 1)

    cost = pl.CostEstimate(
        flops=2 * B * S * S * K_in + 2 * B * S * K_in * K_out,
        transcendentals=0,
        bytes_accessed=(x_t.size + wseq_t.size + w_fused.size) * itemsize
                       + bias_col.size * 4
                       + B * S * K_out * jnp.dtype(out_dtype).itemsize,
    )

    out_t = pl.pallas_call(
        _gcn_kernel,
        out_shape=jax.ShapeDtypeStruct((B, S, K_out), out_dtype),
        grid_spec=pl.GridSpec(
            grid=(num_blocks,),
            in_specs=[
                pl.BlockSpec((bb, S, K_in), lambda i: (i, 0, 0)),   # streamed per step
                pl.BlockSpec((S, S),        lambda i: (0, 0)),      # resident
                pl.BlockSpec((K_in, K_out), lambda i: (0, 0)),      # resident
                pl.BlockSpec((S, 1),        lambda i: (0, 0)),      # resident
            ],
            out_specs=pl.BlockSpec((bb, S, K_out), lambda i: (i, 0, 0)),
        ),
        compiler_params=pltpu.CompilerParams(
            dimension_semantics=("parallel",)),
        cost_estimate=cost,
    )(x_t, wseq_t, w_fused, bias_col)

    # (B, S, C_out*N) -> (B, C_out, N, S)
    return jnp.transpose(out_t.reshape(B, S, C_out, N), (0, 2, 3, 1))


def _reference(x, att, weight_c, weight_seq, bias):
    """Pure-JAX reference reproducing the PyTorch forward exactly."""
    support = jnp.matmul(att, jnp.transpose(x, (0, 3, 2, 1)))        # (B,S,N,Cin)
    output_gcn = jnp.matmul(support, weight_c)                       # (B,S,N,Cout)
    output_fc = jnp.matmul(jnp.transpose(output_gcn, (0, 2, 3, 1)), weight_seq)
    output_fc = jnp.transpose(output_fc, (0, 2, 1, 3))               # (B,Cout,N,S)
    return output_fc + bias


if __name__ == "__main__":
    B, in_c, out_c, node_n, seq_len = 2, 4, 8, 22, 35

    key = jax.random.PRNGKey(0)
    k_x, k_att, k_wc, k_ws, k_b = jax.random.split(key, 5)

    # Deterministic parameter init mirroring reset_parameters():
    # uniform(-stdv, stdv) with stdv = 1/sqrt(node_n)
    stdv = 1.0 / math.sqrt(node_n)
    att = jax.random.uniform(k_att, (node_n, node_n), jnp.float32, -stdv, stdv)
    weight_c = jax.random.uniform(k_wc, (in_c, out_c), jnp.float32, -stdv, stdv)
    weight_seq = jax.random.uniform(k_ws, (seq_len, seq_len), jnp.float32, -stdv, stdv)
    bias = jax.random.uniform(k_b, (seq_len,), jnp.float32, -stdv, stdv)

    x = jax.random.normal(k_x, (B, in_c, node_n, seq_len), jnp.float32)

    ref = _reference(x, att, weight_c, weight_seq, bias)

    # Exact-precision path (safe on all generations, incl. v5e).
    out_f32 = graph_convolution(x, att, weight_c, weight_seq, bias,
                                compute_dtype=jnp.float32)
    out_f32 = jax.block_until_ready(out_f32)
    assert out_f32.shape == (B, out_c, node_n, seq_len), out_f32.shape
    err_f32 = float(jnp.max(jnp.abs(out_f32 - ref)))
    assert jnp.allclose(out_f32, ref, atol=1e-4, rtol=1e-4), err_f32

    # Default path: bf16 MXU operands auto-selected on v6e/v7x (f32 accumulate +
    # f32 epilogue), f32 everywhere else.
    cdt = _default_compute_dtype()
    out_def = graph_convolution(x, att, weight_c, weight_seq, bias)
    out_def = jax.block_until_ready(out_def)
    assert out_def.shape == (B, out_c, node_n, seq_len), out_def.shape
    tol = 3e-2 if cdt == jnp.bfloat16 else 1e-4
    err_def = float(jnp.max(jnp.abs(out_def - ref)))
    assert jnp.allclose(out_def, ref, atol=tol, rtol=tol), err_def

    print("KERNEL_OK")
</pallas_src>

<mosaic_0001>
module attributes {stable_mosaic.version = 11 : i64} {
  func.func @_gcn_kernel(%arg0: i32, %arg1: memref<1x35x88xf32, #tpu.memory_space<vmem>>, %arg2: memref<35x35xf32, #tpu.memory_space<vmem>>, %arg3: memref<88x176xf32, #tpu.memory_space<vmem>>, %arg4: memref<35x1xf32, #tpu.memory_space<vmem>>, %arg5: memref<1x35x176xf32, #tpu.memory_space<vmem>>) attributes {dimension_semantics = [#tpu.dimension_semantics<parallel>], iteration_bounds = array<i64: 2>, scalar_prefetch = 0 : i64, scratch_operands = 0 : i64, tpu.core_type = #tpu.core_type<tc>, window_params = [{transform_indices = @transform_0, window_bounds = array<i64: 1, 35, 88>}, {pipeline_mode = #tpu.pipeline_mode<synchronous>, transform_indices = @transform_1, window_bounds = array<i64: 35, 35>}, {pipeline_mode = #tpu.pipeline_mode<synchronous>, transform_indices = @transform_2, window_bounds = array<i64: 88, 176>}, {pipeline_mode = #tpu.pipeline_mode<synchronous>, transform_indices = @transform_3, window_bounds = array<i64: 35, 1>}, {transform_indices = @transform_4, window_bounds = array<i64: 1, 35, 176>}]} {
    %c0 = arith.constant 0 : index
    %c0_0 = arith.constant 0 : index
    %0 = vector.load %arg2[%c0, %c0_0] : memref<35x35xf32, #tpu.memory_space<vmem>>, vector<35x35xf32>
    %c0_1 = arith.constant 0 : index
    %c0_2 = arith.constant 0 : index
    %1 = vector.load %arg3[%c0_1, %c0_2] : memref<88x176xf32, #tpu.memory_space<vmem>>, vector<88x176xf32>
    %c0_3 = arith.constant 0 : index
    %c0_4 = arith.constant 0 : index
    %2 = vector.load %arg4[%c0_3, %c0_4] : memref<35x1xf32, #tpu.memory_space<vmem>>, vector<35x1xf32>
    %c0_5 = arith.constant 0 : index
    %c0_6 = arith.constant 0 : index
    %c0_7 = arith.constant 0 : index
    %3 = vector.load %arg1[%c0_5, %c0_6, %c0_7] : memref<1x35x88xf32, #tpu.memory_space<vmem>>, vector<1x35x88xf32>
    %4 = vector.shape_cast %3 : vector<1x35x88xf32> to vector<35x88xf32>
    %cst = arith.constant dense<0.000000e+00> : vector<35x88xf32>
    %5 = tpu.matmul %0, %4, %cst {dimension_numbers = #tpu.dot_dimension_numbers<[1], [0], [0], [1], [0, 0, 1, 1], [], []>} : vector<35x35xf32>, vector<35x88xf32>, vector<35x88xf32> -> vector<35x88xf32>
    %cst_8 = arith.constant dense<0.000000e+00> : vector<35x176xf32>
    %6 = tpu.matmul %5, %1, %cst_8 {dimension_numbers = #tpu.dot_dimension_numbers<[1], [0], [0], [1], [0, 0, 1, 1], [], []>} : vector<35x88xf32>, vector<88x176xf32>, vector<35x176xf32> -> vector<35x176xf32>
    %7 = vector.broadcast %2 : vector<35x1xf32> to vector<35x176xf32>
    %8 = arith.addf %6, %7 : vector<35x176xf32>
    %c0_9 = arith.constant 0 : index
    %c0_10 = arith.constant 0 : index
    %c0_11 = arith.constant 0 : index
    %9 = vector.load %arg5[%c0_9, %c0_10, %c0_11] : memref<1x35x176xf32, #tpu.memory_space<vmem>>, vector<1x35x176xf32>
    %10 = vector.shape_cast %9 : vector<1x35x176xf32> to vector<35x176xf32>
    %11 = vector.shape_cast %8 : vector<35x176xf32> to vector<1x35x176xf32>
    tpu.vector_store %arg5[%c0_9, %c0_10, %c0_11], %11 {strides = array<i32>} : memref<1x35x176xf32, #tpu.memory_space<vmem>>, vector<1x35x176xf32>,
    return
  }
  func.func @transform_0(%arg0: i32) -> (i32, i32, i32) {
    %c0_i32 = arith.constant 0 : i32
    %c0_i32_0 = arith.constant 0 : i32
    %c0_i32_1 = arith.constant 0 : i32
    return %arg0, %c0_i32, %c0_i32_0 : i32, i32, i32
  }
  func.func @transform_1(%arg0: i32) -> (i32, i32) {
    %c0_i32 = arith.constant 0 : i32
    %c0_i32_0 = arith.constant 0 : i32
    %c0_i32_1 = arith.constant 0 : i32
    return %c0_i32, %c0_i32_0 : i32, i32
  }
  func.func @transform_2(%arg0: i32) -> (i32, i32) {
    %c0_i32 = arith.constant 0 : i32
    %c0_i32_0 = arith.constant 0 : i32
    %c0_i32_1 = arith.constant 0 : i32
    return %c0_i32, %c0_i32_0 : i32, i32
  }
  func.func @transform_3(%arg0: i32) -> (i32, i32) {
    %c0_i32 = arith.constant 0 : i32
    %c0_i32_0 = arith.constant 0 : i32
    %c0_i32_1 = arith.constant 0 : i32
    return %c0_i32, %c0_i32_0 : i32, i32
  }
  func.func @transform_4(%arg0: i32) -> (i32, i32, i32) {
    %c0_i32 = arith.constant 0 : i32
    %c0_i32_0 = arith.constant 0 : i32
    %c0_i32_1 = arith.constant 0 : i32
    return %arg0, %c0_i32, %c0_i32_0 : i32, i32, i32
  }
}

</mosaic_0001>

<bundles_post_ra>
// kernel: tpu_custom_call.1
= control target key start
LH: loop header
LB: loop body
LE: loop exit
PB: predicated region body
PF: predicated region fallthrough
CT: control target
= control target key end

     0   :  { %9 = vsyncpa [#allocation3], 0  ;;  %s635_s15 = smov 0   ;;  %s771_s0 = inlined_call_operand.vmem [shape: f32[2,35,88], index: 0, kind: input, shape index: {}]   ;;  %s772_s1 = inlined_call_operand.hbm [shape: f32[35,35], index: 1, kind: input, shape index: {}]   ;;  %s773_s2 = inlined_call_operand.vmem [shape: f32[88,176], index: 2, kind: input, shape index: {}]   ;;  %s774_s3 = inlined_call_operand.vmem [shape: f32[35,1], index: 3, kind: input, shape index: {}]   ;;  %s775_s4 = inlined_call_operand.vmem [shape: f32[2,35,176], index: 4, kind: output, shape index: {}]  }
   0x1 LB: > { %s146_s18 = sshll.u32 %s772_s1, 4  ;;  %s488_s19 = sadd.s32 4294967295, %s604_s15   ;;  %s604_s15 = sphi %s635_s15, %s15_s15   ;;  %s147_s18 = int_to_ptr.hbm [resolvable:$true] %s146_s18 }
   0x2   : > { %p490_p0 = scmp.ge.s32.totalorder %s604_s15, 1  ;;  %p135_p1 = scmp.lt.s32.totalorder %s604_s15, 3 }
   0x3   : > { %p547_p2 = scmp.eq.s32.totalorder %s488_s19, 0  ;;  %s606_s20 = smov [#allocation2]  }
   0x4   : > { %p136_p3 = pnand %p490_p0, %p135_p1  ;;  %s148_s21 = sshll.u32 %s606_s20, 4  ;;  %s149_s21 = int_to_ptr.vmem [resolvable:$true] %s148_s21 }
   0x5   : > { %s607_s22 = smov 128   ;;  %s608_s23 = smov 8  }
   0x6   : > { %p543_p4 = pneg %p136_p3  ;;  %178 = sbr.rel (%p136_p3) target bundleno = 322 (0x142), region = 36 }
   0x8   : > { %p544_p5 = pnand %p547_p2, %p543_p4 }
   0xa   : > { %546 = dma.hbm_to_vmem [thread:$0]  (!%p544_p5), %s147_s18, 640, %s149_s21, [#allocation3], %s607_s22, %s607_s22, %s608_s23  }
   0xb   : > { %599 = dma.done.wait (%p547_p2), [#allocation3], 640  }
   0xc   : > { %601 = vsyncadd (%p547_p2), [#allocation3], 4294966656  ;;  %p205_p6 = scmp.lt.s32.totalorder %s488_s19, 1  ;;  %vm268_vm0 = vcmask 1042432   ;;  %v215_v5 = vld [vmem:[#allocation2] sm:$0xff]  ;;  %vm252_vm1 = vcmask 285696  }
   0xd   : > { %v240_v6 = vld [vmem:[%s773_s2 + $0xa0] sm:$0xff]  ;;  %v238_v7 = vld [vmem:[%s773_s2 + $0x90] sm:$0xff]  ;;  %v241_v9 = vld [vmem:[%s773_s2 + $0xa8] sm:$0xff]  ;;  %v609_v33 = vmov 0   ;;  %vm329_vm2 = vcmask 719872   ;;  %vm410_vm3 = vcmask 392192  }
   0xe   : > { %s777_s19 = smov (!%p205_p6, %s488_s19), 1  ;;  %350 = vmatpush.msra.mxu1 %v240_v6  ;;  %515 = vmatpush.msra.mxu3 %v240_v6  ;;  %v236_v8 = vld [vmem:[%s773_s2 + $0x80] sm:$0xff]  ;;  %v234_v10 = vld [vmem:[%s773_s2 + $0x70] sm:$0xff]  ;;  %v239_v11 = vld [vmem:[%s773_s2 + $0x98] sm:$0xff]  ;;  %vm419_vm4 = vcmask 387072  }
   0xf   : > { %s537_s24 = smul.u32 40, %s777_s19  ;;  %526 = vmatpush.msra.mxu2 %v241_v9  ;;  %v216_v12 = vld [vmem:[#allocation2 + $0x8] sm:$0xff]  ;;  %v232_v14 = vld [vmem:[%s773_s2 + $0x60] sm:$0xff]  ;;  %v235_v15 = vld [vmem:[%s773_s2 + $0x78] sm:$0xff]  ;;  %561 = vset.pattern.permute.xlu0 %v609_v33 }
  0x10   : > { %351 = vmatpush.msra.mxu1 %v238_v7  ;;  %516 = vmatpush.msra.mxu3 %v238_v7  ;;  %v237_v13 = vld [vmem:[%s773_s2 + $0x88] sm:$0xff]  ;;  %v230_v16 = vld [vmem:[%s773_s2 + $0x50] sm:$0xff]  ;;  %v228_v18 = vld [vmem:[%s773_s2 + $0x40] sm:$0xff]  ;;  %s538_s8 = smul.u32 80, %s777_s19 }
  0x11   : > { %s209_s27 = scalar_lea.vmem %s771_s0, %s537_s24  ;;  %527 = vmatpush.msra.mxu2 %v239_v11  ;;  %v233_v17 = vld [vmem:[%s773_s2 + $0x68] sm:$0xff]  ;;  %v231_v19 = vld [vmem:[%s773_s2 + $0x58] sm:$0xff]  ;;  %v226_v20 = vld [vmem:[%s773_s2 + $0x30] sm:$0xff]  ;;  %562 = vset.pattern.permute.xlu1 %v609_v33 }
  0x12   : > { %v251_v0 = vld [vmem:[%s209_s27 + $0x20] sm:$0x7]  ;;  %v250_v1 = vld [vmem:[%s209_s27 + $0x18] sm:$0xff]  ;;  %v249_v2 = vld [vmem:[%s209_s27 + $0x10] sm:$0xff]  ;;  %352 = vmatpush.msra.mxu1 %v236_v8  ;;  %517 = vmatpush.msra.mxu3 %v236_v8  ;;  %s752_s11 = scalar_lea.vmem %s775_s4, %s538_s8 }
  0x13   : > { %497 = vmatpush.msk.msra.mxu0 %vm268_vm0, %v251_v0  ;;  %v248_v3 = vld [vmem:[%s209_s27 + $0x8] sm:$0xff]  ;;  %v247_v4 = vld [vmem:[%s209_s27] sm:$0xff]  ;;  %528 = vmatpush.msra.mxu2 %v237_v13  ;;  %v217_v21 = vld [vmem:[#allocation2 + $0x10] sm:$0xff] }
  0x14   : > { %353 = vmatpush.msra.mxu1 %v234_v10  ;;  %518 = vmatpush.msra.mxu3 %v234_v10  ;;  %v224_v22 = vld [vmem:[%s773_s2 + $0x20] sm:$0xff]  ;;  %v222_v23 = vld [vmem:[%s773_s2 + $0x10] sm:$0xff]  ;;  %v218_v25 = vld [vmem:[#allocation2 + $0x18] sm:$0xff] }
  0x15   : > { %284 = vmatpush.msra.mxu0 %v250_v1  ;;  %529 = vmatpush.msra.mxu2 %v235_v15  ;;  %v220_v24 = vld [vmem:[%s773_s2] sm:$0xff]  ;;  %v229_v27 = vld [vmem:[%s773_s2 + $0x48] sm:$0xff]  ;;  %v227_v28 = vld [vmem:[%s773_s2 + $0x38] sm:$0xff] }
  0x16   : > { %354 = vmatpush.msra.mxu1 %v232_v14  ;;  %519 = vmatpush.msra.mxu3 %v232_v14  ;;  %v219_v26 = vld [vmem:[#allocation2 + $0x20] sm:$0x7]  ;;  %v225_v29 = vld [vmem:[%s773_s2 + $0x28] sm:$0xff]  ;;  %v223_v30 = vld [vmem:[%s773_s2 + $0x18] sm:$0xff] }
  0x17   : > { %285 = vmatpush.msra.mxu0 %v249_v2  ;;  %530 = vmatpush.msra.mxu2 %v233_v17  ;;  %v221_v31 = vld [vmem:[%s773_s2 + $0x8] sm:$0xff]  ;;  %v242_v32 = vld [vmem:[%s774_s3] sm:$0xff]  ;;  %v244_v36 = vld [vmem:[%s774_s3 + $0x10] sm:$0xff] }
  0x18   : > { %355 = vmatpush.msra.mxu1 %v230_v16  ;;  %520 = vmatpush.msra.mxu3 %v230_v16  ;;  %v243_v34 = vld [vmem:[%s774_s3 + $0x8] sm:$0xff]  ;;  %v246_v37 = vld [vmem:[%s774_s3 + $0x20] sm:$0x7]  ;;  %v245_v39 = vld [vmem:[%s774_s3 + $0x18] sm:$0xff] }
  0x19   : > { %286 = vmatpush.msra.mxu0 %v248_v3  ;;  %531 = vmatpush.msra.mxu2 %v231_v19 }
  0x1a   : > { %356 = vmatpush.msra.mxu1 %v228_v18  ;;  %521 = vmatpush.msra.mxu3 %v228_v18 }
  0x1b   : > { %287 = vmatpush.msra.mxu0 %v247_v4  ;;  %532 = vmatpush.msra.mxu2 %v229_v27 }
  0x1c   : > { %498 = vmatmul.msk.f32.vlgmr.msra.gmra.mxu0 %vm252_vm1, %v215_v5  ;;  %357 = vmatpush.msra.mxu1 %v226_v20 }
  0x1d   : > { %522 = vmatpush.msra.mxu3 %v226_v20  ;;  %533 = vmatpush.msra.mxu2 %v227_v28 }
  0x1e   : > { %358 = vmatpush.msra.mxu1 %v224_v22  ;;  %306 = vperm.xlu0 %561, %v242_v32  }
  0x1f   : > { %523 = vmatpush.msra.mxu3 %v224_v22  ;;  %534 = vmatpush.msra.mxu2 %v225_v29 }
  0x20   : > { %359 = vmatpush.msra.mxu1 %v222_v23  ;;  %563 = vset.pattern.permute.xlu2 %v609_v33 }
  0x21   : > { %524 = vmatpush.msra.mxu3 %v222_v23  ;;  %535 = vmatpush.msra.mxu2 %v223_v30 }
  0x22   : > { %360 = vmatpush.msra.mxu1 %v220_v24  ;;  %316 = vperm.xlu1 %562, %v244_v36  }
  0x23   : > { %525 = vmatpush.msra.mxu3 %v220_v24  ;;  %536 = vmatpush.msra.mxu2 %v221_v31 }
  0x24   : > { %499 = vmatmul.msk.f32.gmra.mxu0 %vm252_vm1, %v216_v12  ;;  %382 = vmatpush.msrb.mxu1 %v241_v9 }
  0x25   : > { %326 = vperm.xlu2 %563, %v246_v37  }
  0x26   : > { %383 = vmatpush.msrb.mxu1 %v239_v11  ;;  %311 = vperm.xlu0 %561, %v243_v34  }
  0x28   : > { %384 = vmatpush.msrb.mxu1 %v237_v13 }
  0x2a   : > { %385 = vmatpush.msrb.mxu1 %v235_v15  ;;  %321 = vperm.xlu1 %562, %v245_v39  }
  0x2c   : > { %500 = vmatmul.msk.f32.gmra.mxu0 %vm252_vm1, %v217_v21  ;;  %386 = vmatpush.msrb.mxu1 %v233_v17 }
  0x2e   : > { %387 = vmatpush.msrb.mxu1 %v231_v19 }
  0x30   : > { %388 = vmatpush.msrb.mxu1 %v229_v27 }
  0x32   : > { %389 = vmatpush.msrb.mxu1 %v227_v28 }
  0x34   : > { %501 = vmatmul.msk.f32.gmra.mxu0 %vm252_vm1, %v218_v25  ;;  %390 = vmatpush.msrb.mxu1 %v225_v29 }
  0x36   : > { %391 = vmatpush.msrb.mxu1 %v223_v30 }
  0x38   : > { %392 = vmatpush.msrb.mxu1 %v221_v31 }
  0x3c   : > { %502 = vmatmul.msk.f32.gmra.mxu0 %vm252_vm1, %v219_v26 }
  0x7f   : > { %v327_v63 = vpop.permute.xlu2 %326 }
  0x90   : > { %v307_v43 = vpop.permute.xlu0 %306 }
  0x94   : > { %v317_v53 = vpop.permute.xlu1 %316 }
  0x98   : > { %v312_v48 = vpop.permute.xlu0 %311 }
  0x99   : > { %v289_v35 = vpop.f32.mrf.mxu0 }
  0x9a   : > { %503 = vmatmul.msk.f32.vlgmr.msra.gmra.mxu1 %vm329_vm2, %v289_v35 }
  0x9c   : > { %v322_v58 = vpop.permute.xlu1 %321 }
  0xa1   : > { %v292_v38 = vpop.f32.mrf.mxu0 }
  0xa2   : > { %504 = vmatmul.msk.f32.vlgmr.msra.gmra.mxu3 %vm329_vm2, %v292_v38  ;;  %508 = vmatmul.msk.f32.vlgmr.msrb.gmra.mxu1 %vm329_vm2, %v289_v35 }
  0xa3   : > { %509 = vmatmul.msk.f32.vlgmr.msra.gmra.mxu2 %vm329_vm2, %v292_v38 }
  0xa9   : > { %v295_v40 = vpop.f32.mrf.mxu0 }
  0xaa   : > { %505 = vmatmul.msk.f32.gmra.mxu3 %vm329_vm2, %v295_v40 }
  0xab   : > { %510 = vmatmul.msk.f32.gmra.mxu2 %vm329_vm2, %v295_v40 }
  0xb1   : > { %v298_v41 = vpop.f32.mrf.mxu0 }
  0xb2   : > { %506 = vmatmul.msk.f32.gmra.mxu3 %vm329_vm2, %v298_v41 }
  0xb3   : > { %511 = vmatmul.msk.f32.gmra.mxu2 %vm329_vm2, %v298_v41 }
  0xb9   : > { %v301_v42 = vpop.f32.mrf.mxu0 }
  0xba   : > { %507 = vmatmul.msk.f32.gmra.mxu3 %vm329_vm2, %v301_v42 }
  0xbb   : > { %512 = vmatmul.msk.f32.gmra.mxu2 %vm329_vm2, %v301_v42 }
 0x117   : > { %v362_v44 = vpop.f32.mrf.mxu1 }
 0x118   : > { %v363_v45 = vadd.f32 %v362_v44, %v307_v43 }
 0x11a   : > { %409 = vst [vmem:[%s752_s11] sm:$0xff] %v363_v45 }
 0x11f   : > { %v394_v46 = vpop.f32.mrf.mxu1 }
 0x120   : > { %v395_v47 = vadd.f32 %v394_v46, %v307_v43 }
 0x122   : > { %411 = vst.msk [vmem:[%s752_s11 + $0x8] sm:$0xff] %vm410_vm3, %v395_v47 }
 0x125   : > { %v365_v49 = vpop.f32.mrf.mxu3 }
 0x126   : > { %v366_v50 = vadd.f32 %v365_v49, %v312_v48  ;;  %v397_v51 = vpop.f32.mrf.mxu2 }
 0x127   : > { %v398_v52 = vadd.f32 %v397_v51, %v312_v48 }
 0x128   : > { %412 = vst [vmem:[%s752_s11 + $0x10] sm:$0xff] %v366_v50 }
 0x129   : > { %413 = vst.msk [vmem:[%s752_s11 + $0x18] sm:$0xff] %vm410_vm3, %v398_v52 }
 0x12d   : > { %v368_v54 = vpop.f32.mrf.mxu3 }
 0x12e   : > { %v369_v55 = vadd.f32 %v368_v54, %v317_v53  ;;  %v400_v56 = vpop.f32.mrf.mxu2 }
 0x12f   : > { %v401_v57 = vadd.f32 %v400_v56, %v317_v53 }
 0x130   : > { %414 = vst [vmem:[%s752_s11 + $0x20] sm:$0xff] %v369_v55 }
 0x131   : > { %415 = vst.msk [vmem:[%s752_s11 + $0x28] sm:$0xff] %vm410_vm3, %v401_v57 }
 0x135   : > { %v371_v59 = vpop.f32.mrf.mxu3 }
 0x136   : > { %v372_v60 = vadd.f32 %v371_v59, %v322_v58  ;;  %v403_v61 = vpop.f32.mrf.mxu2 }
 0x137   : > { %v404_v62 = vadd.f32 %v403_v61, %v322_v58 }
 0x138   : > { %416 = vst [vmem:[%s752_s11 + $0x30] sm:$0xff] %v372_v60 }
 0x139   : > { %417 = vst.msk [vmem:[%s752_s11 + $0x38] sm:$0xff] %vm410_vm3, %v404_v62 }
 0x13d   : > { %v374_v0 = vpop.f32.mrf.mxu3 }
 0x13e   : > { %v375_v1 = vadd.f32 %v374_v0, %v327_v63  ;;  %v406_v2 = vpop.f32.mrf.mxu2 }
 0x13f   : > { %v407_v3 = vadd.f32 %v406_v2, %v327_v63 }
 0x140   : > { %418 = vst [vmem:[%s752_s11 + $0x40] sm:$0x7] %v375_v1 }
 0x141   : > { %420 = vst.msk [vmem:[%s752_s11 + $0x48] sm:$0x7] %vm419_vm4, %v407_v3 }
 0x142 PF: > { %s15_s15 = sadd.s32 1, %s604_s15  }
 0x143   : > { %p12_p7 = scmp.ge.s32.totalorder %s15_s15, 4  }
 0x145   :  { %14 = sbr.rel (!%p12_p7) target bundleno = 1 (0x1), region = 71 }
 0x14a   :  { %442 = vsyncpa [#allocation3], 1 }
 0x14b   :  { %444 = vsyncpa [#allocation3 + $0x1], 1 }

</bundles_post_ra>
